<compile_context>
chip_gen: v7x
topology: tpu7x:2x2x1
jax: 0.10.0
libtpu: 0.0.40
codegen_flags: <defaults>
</compile_context>

<pallas_src>
import jax
import jax.numpy as jnp
from jax.experimental import pallas as pl
from jax.experimental.pallas import tpu as pltpu

# ---------------- model dims (small, consistent with the module) ----------------
VOCAB = 50
EMB = 16      # embedded_dim
HID = 32      # hidden_dim
OUT = 1       # output_dim (VPU-reduction fc path assumes OUT == 1)
BATCH = 2
SEQ = 8


def spamham_kernel(tok_ref,    # (T*Bp, 1) int32 time-major padded tokens (pad id = -1)
                   table_ref,  # (VOCAB, 8H) f32  emb @ [Wih_f^T | Wih_b^T], i/f/o lanes pre-scaled by 0.5
                   ball_ref,   # (1, 8H)  f32  fused biases, same pre-scale
                   whf_ref,    # (H, 4H)  f32  forward W_hh^T, i/f/o columns pre-scaled by 0.5
                   fcwf_ref,   # (1, H)   f32  fc weight row, forward half
                   fcwb_ref,   # (1, H)   f32  fc weight row, reverse half
                   fcb_ref,    # (1, OUT) f32  fc bias
                   out_ref,    # (Bp, OUT) f32
                   proj_ref):  # (T*Bp, 8H) f32 VMEM scratch (tile-aligned per-step slabs)
    TB = tok_ref.shape[0]
    Bp = out_ref.shape[0]
    T = TB // Bp
    V, H8 = table_ref.shape
    H4 = H8 // 2
    H = H4 // 4

    # ---- fused embedding gather + input projection for BOTH directions (one matmul) ----
    tok = tok_ref[...]                                                    # (T*Bp, 1) i32
    onehot = (jax.lax.broadcasted_iota(jnp.int32, (TB, V), 1) == tok
              ).astype(jnp.float32)                                       # (T*Bp, V); pad rows all-zero
    proj_ref[...] = (jnp.dot(onehot, table_ref[...],
                             preferred_element_type=jnp.float32)
                     + ball_ref[...])                                     # (T*Bp, 8H)

    # ---- forward recurrence: per step only the serial h @ W_hh dot + ONE gate tanh ----
    whf = whf_ref[...]                                                    # hoisted load
    h = jnp.zeros((Bp, H), jnp.float32)
    c = jnp.zeros((Bp, H), jnp.float32)
    for t in range(T):  # static trip count, unrolled; slab starts are multiples of 8
        gates = proj_ref[t * Bp:(t + 1) * Bp, 0:H4] + jnp.dot(
            h, whf, preferred_element_type=jnp.float32)                   # (Bp, 4H), i/f/o lanes = z/2
        th = jnp.tanh(gates)            # single full-block EUP push
        sg = 0.5 * th + 0.5             # sigmoid(z) = 0.5*tanh(z/2)+0.5 on the pre-scaled lanes
        i_g = sg[:, 0 * H:1 * H]
        f_g = sg[:, 1 * H:2 * H]
        g_g = th[:, 2 * H:3 * H]
        o_g = sg[:, 3 * H:4 * H]
        c = f_g * c + i_g * g_g
        h = o_g * jnp.tanh(c)
    h_fwd = h                                         # == output[:, -1, :H]

    # ---- reverse direction: first reverse step from zero state -> only x[:, T-1] ----
    gates_b = proj_ref[(T - 1) * Bp:T * Bp, H4:H8]    # bias folded, lanes pre-scaled
    th_b = jnp.tanh(gates_b)
    sg_b = 0.5 * th_b + 0.5
    i_b = sg_b[:, 0 * H:1 * H]
    g_b = th_b[:, 2 * H:3 * H]
    o_b = sg_b[:, 3 * H:4 * H]
    h_bwd = o_b * jnp.tanh(i_b * g_b)                 # == output[:, -1, H:]

    # ---- dropout (eval == identity) + fc as VPU multiply + lane reduction (no N=1 MXU dots) ----
    # TODO(synk): training-mode dropout (random mask + 1/(1-p) scale) not modeled.
    out_ref[...] = (jnp.sum(h_fwd * fcwf_ref[...], axis=-1, keepdims=True)
                    + jnp.sum(h_bwd * fcwb_ref[...], axis=-1, keepdims=True)
                    + fcb_ref[...])


def init_params(key):
    ks = jax.random.split(key, 10)
    k = 1.0 / jnp.sqrt(jnp.float32(HID))
    u = lambda kk, shape: jax.random.uniform(kk, shape, jnp.float32, -k, k)
    return dict(
        embedding=jax.random.normal(ks[0], (VOCAB, EMB), jnp.float32),  # nn.Embedding ~ N(0,1)
        w_ih_f=u(ks[1], (4 * HID, EMB)),
        w_hh_f=u(ks[2], (4 * HID, HID)),
        b_ih_f=u(ks[3], (4 * HID,)),
        b_hh_f=u(ks[4], (4 * HID,)),
        w_ih_b=u(ks[5], (4 * HID, EMB)),
        b_ih_b=u(ks[6], (4 * HID,)),
        b_hh_b=u(ks[7], (4 * HID,)),
        fc_w=u(ks[8], (OUT, 2 * HID)),
        fc_b=u(ks[9], (OUT,)),
    )


def prepare_kernel_params(params):
    """One-time weight plumbing (fuse emb into W_ih, fold biases, 0.5 pre-scale) off the hot path."""
    H = HID
    win = jnp.concatenate([params["w_ih_f"].T, params["w_ih_b"].T], axis=1)        # (E, 8H)
    ball = jnp.concatenate([params["b_ih_f"] + params["b_hh_f"],
                            params["b_ih_b"] + params["b_hh_b"]])[None, :]         # (1, 8H)
    table = jnp.dot(params["embedding"], win,
                    precision=jax.lax.Precision.HIGHEST)                            # (VOCAB, 8H)

    # 0.5 pre-scale on i/f/o lane groups (both directions) so sigmoid == 0.5*tanh(.)+0.5
    scale1 = jnp.concatenate([jnp.full((H,), 0.5), jnp.full((H,), 0.5),
                              jnp.ones((H,)), jnp.full((H,), 0.5)])                 # (4H,) i,f,g,o
    scale = jnp.concatenate([scale1, scale1])                                       # (8H,)
    table = table * scale[None, :]
    ball = ball * scale[None, :]
    whf = params["w_hh_f"].T * scale1[None, :]                                      # (H, 4H)

    fcw = params["fc_w"].T                                                          # (2H, OUT)
    return dict(
        table=table.astype(jnp.float32),
        ball=ball.astype(jnp.float32),
        whf=whf.astype(jnp.float32),
        fcw_f=fcw[:H, :].T.astype(jnp.float32),       # (OUT, H) == (1, H) broadcast row
        fcw_b=fcw[H:, :].T.astype(jnp.float32),       # (OUT, H) == (1, H)
        fcb=params["fc_b"][None, :].astype(jnp.float32),                            # (1, OUT)
    )


def spamham_forward(tokens, kp):
    B, T = tokens.shape
    Bp = max(8, -(-B // 8) * 8)   # pad batch to the f32 sublane tile
    # Tiny int plumbing only: time-major, padded rows get an out-of-vocab id (-1)
    # so their one-hot rows are all-zero inside the kernel.
    tok_tm = jnp.full((T, Bp), -1, jnp.int32).at[:, :B].set(
        jnp.transpose(tokens).astype(jnp.int32)).reshape(T * Bp, 1)

    vmem = pl.BlockSpec(memory_space=pltpu.MemorySpace.VMEM)
    out = pl.pallas_call(
        spamham_kernel,
        out_shape=jax.ShapeDtypeStruct((Bp, OUT), jnp.float32),
        in_specs=[vmem] * 7,
        out_specs=vmem,
        scratch_shapes=[pltpu.VMEM((T * Bp, 8 * HID), jnp.float32)],
    )(tok_tm, kp["table"], kp["ball"], kp["whf"],
      kp["fcw_f"], kp["fcw_b"], kp["fcb"])
    return out[:B]


def spamham_reference(tokens, params):
    """Pure-JAX reference of the PyTorch forward (eval mode)."""
    emb = params["embedding"][tokens]  # (B, T, E)
    B, T, _ = emb.shape
    # forward direction
    h = jnp.zeros((B, HID), jnp.float32)
    c = jnp.zeros((B, HID), jnp.float32)
    for t in range(T):
        g = (emb[:, t, :] @ params["w_ih_f"].T + params["b_ih_f"]
             + h @ params["w_hh_f"].T + params["b_hh_f"])
        i_g = jax.nn.sigmoid(g[:, 0 * HID:1 * HID])
        f_g = jax.nn.sigmoid(g[:, 1 * HID:2 * HID])
        g_g = jnp.tanh(g[:, 2 * HID:3 * HID])
        o_g = jax.nn.sigmoid(g[:, 3 * HID:4 * HID])
        c = f_g * c + i_g * g_g
        h = o_g * jnp.tanh(c)
    # reverse direction, first step only (== output[:, -1, HID:])
    g = emb[:, T - 1, :] @ params["w_ih_b"].T + params["b_ih_b"] + params["b_hh_b"]
    i_b = jax.nn.sigmoid(g[:, 0 * HID:1 * HID])
    g_b = jnp.tanh(g[:, 2 * HID:3 * HID])
    o_b = jax.nn.sigmoid(g[:, 3 * HID:4 * HID])
    h_b = o_b * jnp.tanh(i_b * g_b)
    last = jnp.concatenate([h, h_b], axis=-1)
    return last @ params["fc_w"].T + params["fc_b"]


if __name__ == "__main__":
    key = jax.random.PRNGKey(0)
    pkey, xkey = jax.random.split(key)
    params = init_params(pkey)
    tokens = jax.random.randint(xkey, (BATCH, SEQ), 0, VOCAB, dtype=jnp.int32)

    kparams = prepare_kernel_params(params)
    out = spamham_forward(tokens, kparams)
    out = jax.block_until_ready(out)

    ref = spamham_reference(tokens, params)
    assert out.shape == (BATCH, OUT), out.shape
    assert jnp.allclose(out, ref, atol=1e-3, rtol=1e-3), (out, ref)
    print("KERNEL_OK")
</pallas_src>

<mosaic_0001>
module attributes {stable_mosaic.version = 11 : i64} {
  func.func @spamham_kernel(%arg0: memref<64x1xi32, #tpu.memory_space<vmem>>, %arg1: memref<50x256xf32, #tpu.memory_space<vmem>>, %arg2: memref<1x256xf32, #tpu.memory_space<vmem>>, %arg3: memref<32x128xf32, #tpu.memory_space<vmem>>, %arg4: memref<1x32xf32, #tpu.memory_space<vmem>>, %arg5: memref<1x32xf32, #tpu.memory_space<vmem>>, %arg6: memref<1x1xf32, #tpu.memory_space<vmem>>, %arg7: memref<8x1xf32, #tpu.memory_space<vmem>>, %arg8: memref<64x256xf32, #tpu.memory_space<vmem>>) attributes {dimension_semantics = [], scalar_prefetch = 0 : i64, scratch_operands = 1 : i64, tpu.core_type = #tpu.core_type<tc>} {
    %c0 = arith.constant 0 : index
    %c0_0 = arith.constant 0 : index
    %0 = vector.load %arg0[%c0, %c0_0] : memref<64x1xi32, #tpu.memory_space<vmem>>, vector<64x1xi32>
    %1 = tpu.iota {dimensions = array<i32: 1>} : vector<64x50xi32>
    %2 = vector.broadcast %0 : vector<64x1xi32> to vector<64x50xi32>
    %3 = arith.cmpi eq, %1, %2 : vector<64x50xi32>
    %4 = arith.extui %3 : vector<64x50xi1> to vector<64x50xi32>
    %5 = arith.sitofp %4 : vector<64x50xi32> to vector<64x50xf32>
    %c0_1 = arith.constant 0 : index
    %c0_2 = arith.constant 0 : index
    %6 = vector.load %arg1[%c0_1, %c0_2] : memref<50x256xf32, #tpu.memory_space<vmem>>, vector<50x256xf32>
    %cst = arith.constant dense<0.000000e+00> : vector<64x256xf32>
    %7 = tpu.matmul %5, %6, %cst {dimension_numbers = #tpu.dot_dimension_numbers<[1], [0], [0], [1], [0, 0, 1, 1], [], []>} : vector<64x50xf32>, vector<50x256xf32>, vector<64x256xf32> -> vector<64x256xf32>
    %c0_3 = arith.constant 0 : index
    %c0_4 = arith.constant 0 : index
    %8 = vector.load %arg2[%c0_3, %c0_4] : memref<1x256xf32, #tpu.memory_space<vmem>>, vector<1x256xf32>
    %9 = vector.broadcast %8 : vector<1x256xf32> to vector<64x256xf32>
    %10 = arith.addf %7, %9 : vector<64x256xf32>
    %c0_5 = arith.constant 0 : index
    %c0_6 = arith.constant 0 : index
    %11 = vector.load %arg8[%c0_5, %c0_6] : memref<64x256xf32, #tpu.memory_space<vmem>>, vector<64x256xf32>
    tpu.vector_store %arg8[%c0_5, %c0_6], %10 {strides = array<i32>} : memref<64x256xf32, #tpu.memory_space<vmem>>, vector<64x256xf32>,
    %c0_7 = arith.constant 0 : index
    %c0_8 = arith.constant 0 : index
    %12 = vector.load %arg3[%c0_7, %c0_8] : memref<32x128xf32, #tpu.memory_space<vmem>>, vector<32x128xf32>
    %cst_9 = arith.constant 0.000000e+00 : f32
    %13 = vector.broadcast %cst_9 : f32 to vector<8x32xf32>
    %cst_10 = arith.constant 0.000000e+00 : f32
    %14 = vector.broadcast %cst_10 : f32 to vector<8x32xf32>
    %c0_11 = arith.constant 0 : index
    %c0_12 = arith.constant 0 : index
    %15 = vector.load %arg8[%c0_11, %c0_12] : memref<64x256xf32, #tpu.memory_space<vmem>>, vector<8x128xf32>
    %cst_13 = arith.constant dense<0.000000e+00> : vector<8x128xf32>
    %16 = tpu.matmul %13, %12, %cst_13 {dimension_numbers = #tpu.dot_dimension_numbers<[1], [0], [0], [1], [0, 0, 1, 1], [], []>} : vector<8x32xf32>, vector<32x128xf32>, vector<8x128xf32> -> vector<8x128xf32>
    %17 = arith.addf %15, %16 : vector<8x128xf32>
    %18 = math.tanh %17 : vector<8x128xf32>
    %cst_14 = arith.constant 5.000000e-01 : f32
    %19 = vector.broadcast %cst_14 : f32 to vector<8x128xf32>
    %20 = arith.mulf %19, %18 : vector<8x128xf32>
    %cst_15 = arith.constant 5.000000e-01 : f32
    %21 = vector.broadcast %cst_15 : f32 to vector<8x128xf32>
    %22 = arith.addf %20, %21 : vector<8x128xf32>
    %23 = vector.extract_strided_slice %22 {offsets = [0, 0], sizes = [8, 32], strides = [1, 1]} : vector<8x128xf32> to vector<8x32xf32>
    %24 = vector.extract_strided_slice %22 {offsets = [0, 32], sizes = [8, 32], strides = [1, 1]} : vector<8x128xf32> to vector<8x32xf32>
    %25 = vector.extract_strided_slice %18 {offsets = [0, 64], sizes = [8, 32], strides = [1, 1]} : vector<8x128xf32> to vector<8x32xf32>
    %26 = vector.extract_strided_slice %22 {offsets = [0, 96], sizes = [8, 32], strides = [1, 1]} : vector<8x128xf32> to vector<8x32xf32>
    %27 = arith.mulf %24, %14 : vector<8x32xf32>
    %28 = arith.mulf %23, %25 : vector<8x32xf32>
    %29 = arith.addf %27, %28 : vector<8x32xf32>
    %30 = math.tanh %29 : vector<8x32xf32>
    %31 = arith.mulf %26, %30 : vector<8x32xf32>
    %c8 = arith.constant 8 : index
    %c0_16 = arith.constant 0 : index
    %32 = vector.load %arg8[%c8, %c0_16] : memref<64x256xf32, #tpu.memory_space<vmem>>, vector<8x128xf32>
    %cst_17 = arith.constant dense<0.000000e+00> : vector<8x128xf32>
    %33 = tpu.matmul %31, %12, %cst_17 {dimension_numbers = #tpu.dot_dimension_numbers<[1], [0], [0], [1], [0, 0, 1, 1], [], []>} : vector<8x32xf32>, vector<32x128xf32>, vector<8x128xf32> -> vector<8x128xf32>
    %34 = arith.addf %32, %33 : vector<8x128xf32>
    %35 = math.tanh %34 : vector<8x128xf32>
    %cst_18 = arith.constant 5.000000e-01 : f32
    %36 = vector.broadcast %cst_18 : f32 to vector<8x128xf32>
    %37 = arith.mulf %36, %35 : vector<8x128xf32>
    %cst_19 = arith.constant 5.000000e-01 : f32
    %38 = vector.broadcast %cst_19 : f32 to vector<8x128xf32>
    %39 = arith.addf %37, %38 : vector<8x128xf32>
    %40 = vector.extract_strided_slice %39 {offsets = [0, 0], sizes = [8, 32], strides = [1, 1]} : vector<8x128xf32> to vector<8x32xf32>
    %41 = vector.extract_strided_slice %39 {offsets = [0, 32], sizes = [8, 32], strides = [1, 1]} : vector<8x128xf32> to vector<8x32xf32>
    %42 = vector.extract_strided_slice %35 {offsets = [0, 64], sizes = [8, 32], strides = [1, 1]} : vector<8x128xf32> to vector<8x32xf32>
    %43 = vector.extract_strided_slice %39 {offsets = [0, 96], sizes = [8, 32], strides = [1, 1]} : vector<8x128xf32> to vector<8x32xf32>
    %44 = arith.mulf %41, %29 : vector<8x32xf32>
    %45 = arith.mulf %40, %42 : vector<8x32xf32>
    %46 = arith.addf %44, %45 : vector<8x32xf32>
    %47 = math.tanh %46 : vector<8x32xf32>
    %48 = arith.mulf %43, %47 : vector<8x32xf32>
    %c16 = arith.constant 16 : index
    %c0_20 = arith.constant 0 : index
    %49 = vector.load %arg8[%c16, %c0_20] : memref<64x256xf32, #tpu.memory_space<vmem>>, vector<8x128xf32>
    %cst_21 = arith.constant dense<0.000000e+00> : vector<8x128xf32>
    %50 = tpu.matmul %48, %12, %cst_21 {dimension_numbers = #tpu.dot_dimension_numbers<[1], [0], [0], [1], [0, 0, 1, 1], [], []>} : vector<8x32xf32>, vector<32x128xf32>, vector<8x128xf32> -> vector<8x128xf32>
    %51 = arith.addf %49, %50 : vector<8x128xf32>
    %52 = math.tanh %51 : vector<8x128xf32>
    %cst_22 = arith.constant 5.000000e-01 : f32
    %53 = vector.broadcast %cst_22 : f32 to vector<8x128xf32>
    %54 = arith.mulf %53, %52 : vector<8x128xf32>
    %cst_23 = arith.constant 5.000000e-01 : f32
    %55 = vector.broadcast %cst_23 : f32 to vector<8x128xf32>
    %56 = arith.addf %54, %55 : vector<8x128xf32>
    %57 = vector.extract_strided_slice %56 {offsets = [0, 0], sizes = [8, 32], strides = [1, 1]} : vector<8x128xf32> to vector<8x32xf32>
    %58 = vector.extract_strided_slice %56 {offsets = [0, 32], sizes = [8, 32], strides = [1, 1]} : vector<8x128xf32> to vector<8x32xf32>
    %59 = vector.extract_strided_slice %52 {offsets = [0, 64], sizes = [8, 32], strides = [1, 1]} : vector<8x128xf32> to vector<8x32xf32>
    %60 = vector.extract_strided_slice %56 {offsets = [0, 96], sizes = [8, 32], strides = [1, 1]} : vector<8x128xf32> to vector<8x32xf32>
    %61 = arith.mulf %58, %46 : vector<8x32xf32>
    %62 = arith.mulf %57, %59 : vector<8x32xf32>
    %63 = arith.addf %61, %62 : vector<8x32xf32>
    %64 = math.tanh %63 : vector<8x32xf32>
    %65 = arith.mulf %60, %64 : vector<8x32xf32>
    %c24 = arith.constant 24 : index
    %c0_24 = arith.constant 0 : index
    %66 = vector.load %arg8[%c24, %c0_24] : memref<64x256xf32, #tpu.memory_space<vmem>>, vector<8x128xf32>
    %cst_25 = arith.constant dense<0.000000e+00> : vector<8x128xf32>
    %67 = tpu.matmul %65, %12, %cst_25 {dimension_numbers = #tpu.dot_dimension_numbers<[1], [0], [0], [1], [0, 0, 1, 1], [], []>} : vector<8x32xf32>, vector<32x128xf32>, vector<8x128xf32> -> vector<8x128xf32>
    %68 = arith.addf %66, %67 : vector<8x128xf32>
    %69 = math.tanh %68 : vector<8x128xf32>
    %cst_26 = arith.constant 5.000000e-01 : f32
    %70 = vector.broadcast %cst_26 : f32 to vector<8x128xf32>
    %71 = arith.mulf %70, %69 : vector<8x128xf32>
    %cst_27 = arith.constant 5.000000e-01 : f32
    %72 = vector.broadcast %cst_27 : f32 to vector<8x128xf32>
    %73 = arith.addf %71, %72 : vector<8x128xf32>
    %74 = vector.extract_strided_slice %73 {offsets = [0, 0], sizes = [8, 32], strides = [1, 1]} : vector<8x128xf32> to vector<8x32xf32>
    %75 = vector.extract_strided_slice %73 {offsets = [0, 32], sizes = [8, 32], strides = [1, 1]} : vector<8x128xf32> to vector<8x32xf32>
    %76 = vector.extract_strided_slice %69 {offsets = [0, 64], sizes = [8, 32], strides = [1, 1]} : vector<8x128xf32> to vector<8x32xf32>
    %77 = vector.extract_strided_slice %73 {offsets = [0, 96], sizes = [8, 32], strides = [1, 1]} : vector<8x128xf32> to vector<8x32xf32>
    %78 = arith.mulf %75, %63 : vector<8x32xf32>
    %79 = arith.mulf %74, %76 : vector<8x32xf32>
    %80 = arith.addf %78, %79 : vector<8x32xf32>
    %81 = math.tanh %80 : vector<8x32xf32>
    %82 = arith.mulf %77, %81 : vector<8x32xf32>
    %c32 = arith.constant 32 : index
    %c0_28 = arith.constant 0 : index
    %83 = vector.load %arg8[%c32, %c0_28] : memref<64x256xf32, #tpu.memory_space<vmem>>, vector<8x128xf32>
    %cst_29 = arith.constant dense<0.000000e+00> : vector<8x128xf32>
    %84 = tpu.matmul %82, %12, %cst_29 {dimension_numbers = #tpu.dot_dimension_numbers<[1], [0], [0], [1], [0, 0, 1, 1], [], []>} : vector<8x32xf32>, vector<32x128xf32>, vector<8x128xf32> -> vector<8x128xf32>
    %85 = arith.addf %83, %84 : vector<8x128xf32>
    %86 = math.tanh %85 : vector<8x128xf32>
    %cst_30 = arith.constant 5.000000e-01 : f32
    %87 = vector.broadcast %cst_30 : f32 to vector<8x128xf32>
    %88 = arith.mulf %87, %86 : vector<8x128xf32>
    %cst_31 = arith.constant 5.000000e-01 : f32
    %89 = vector.broadcast %cst_31 : f32 to vector<8x128xf32>
    %90 = arith.addf %88, %89 : vector<8x128xf32>
    %91 = vector.extract_strided_slice %90 {offsets = [0, 0], sizes = [8, 32], strides = [1, 1]} : vector<8x128xf32> to vector<8x32xf32>
    %92 = vector.extract_strided_slice %90 {offsets = [0, 32], sizes = [8, 32], strides = [1, 1]} : vector<8x128xf32> to vector<8x32xf32>
    %93 = vector.extract_strided_slice %86 {offsets = [0, 64], sizes = [8, 32], strides = [1, 1]} : vector<8x128xf32> to vector<8x32xf32>
    %94 = vector.extract_strided_slice %90 {offsets = [0, 96], sizes = [8, 32], strides = [1, 1]} : vector<8x128xf32> to vector<8x32xf32>
    %95 = arith.mulf %92, %80 : vector<8x32xf32>
    %96 = arith.mulf %91, %93 : vector<8x32xf32>
    %97 = arith.addf %95, %96 : vector<8x32xf32>
    %98 = math.tanh %97 : vector<8x32xf32>
    %99 = arith.mulf %94, %98 : vector<8x32xf32>
    %c40 = arith.constant 40 : index
    %c0_32 = arith.constant 0 : index
    %100 = vector.load %arg8[%c40, %c0_32] : memref<64x256xf32, #tpu.memory_space<vmem>>, vector<8x128xf32>
    %cst_33 = arith.constant dense<0.000000e+00> : vector<8x128xf32>
    %101 = tpu.matmul %99, %12, %cst_33 {dimension_numbers = #tpu.dot_dimension_numbers<[1], [0], [0], [1], [0, 0, 1, 1], [], []>} : vector<8x32xf32>, vector<32x128xf32>, vector<8x128xf32> -> vector<8x128xf32>
    %102 = arith.addf %100, %101 : vector<8x128xf32>
    %103 = math.tanh %102 : vector<8x128xf32>
    %cst_34 = arith.constant 5.000000e-01 : f32
    %104 = vector.broadcast %cst_34 : f32 to vector<8x128xf32>
    %105 = arith.mulf %104, %103 : vector<8x128xf32>
    %cst_35 = arith.constant 5.000000e-01 : f32
    %106 = vector.broadcast %cst_35 : f32 to vector<8x128xf32>
    %107 = arith.addf %105, %106 : vector<8x128xf32>
    %108 = vector.extract_strided_slice %107 {offsets = [0, 0], sizes = [8, 32], strides = [1, 1]} : vector<8x128xf32> to vector<8x32xf32>
    %109 = vector.extract_strided_slice %107 {offsets = [0, 32], sizes = [8, 32], strides = [1, 1]} : vector<8x128xf32> to vector<8x32xf32>
    %110 = vector.extract_strided_slice %103 {offsets = [0, 64], sizes = [8, 32], strides = [1, 1]} : vector<8x128xf32> to vector<8x32xf32>
    %111 = vector.extract_strided_slice %107 {offsets = [0, 96], sizes = [8, 32], strides = [1, 1]} : vector<8x128xf32> to vector<8x32xf32>
    %112 = arith.mulf %109, %97 : vector<8x32xf32>
    %113 = arith.mulf %108, %110 : vector<8x32xf32>
    %114 = arith.addf %112, %113 : vector<8x32xf32>
    %115 = math.tanh %114 : vector<8x32xf32>
    %116 = arith.mulf %111, %115 : vector<8x32xf32>
    %c48 = arith.constant 48 : index
    %c0_36 = arith.constant 0 : index
    %117 = vector.load %arg8[%c48, %c0_36] : memref<64x256xf32, #tpu.memory_space<vmem>>, vector<8x128xf32>
    %cst_37 = arith.constant dense<0.000000e+00> : vector<8x128xf32>
    %118 = tpu.matmul %116, %12, %cst_37 {dimension_numbers = #tpu.dot_dimension_numbers<[1], [0], [0], [1], [0, 0, 1, 1], [], []>} : vector<8x32xf32>, vector<32x128xf32>, vector<8x128xf32> -> vector<8x128xf32>
    %119 = arith.addf %117, %118 : vector<8x128xf32>
    %120 = math.tanh %119 : vector<8x128xf32>
    %cst_38 = arith.constant 5.000000e-01 : f32
    %121 = vector.broadcast %cst_38 : f32 to vector<8x128xf32>
    %122 = arith.mulf %121, %120 : vector<8x128xf32>
    %cst_39 = arith.constant 5.000000e-01 : f32
    %123 = vector.broadcast %cst_39 : f32 to vector<8x128xf32>
    %124 = arith.addf %122, %123 : vector<8x128xf32>
    %125 = vector.extract_strided_slice %124 {offsets = [0, 0], sizes = [8, 32], strides = [1, 1]} : vector<8x128xf32> to vector<8x32xf32>
    %126 = vector.extract_strided_slice %124 {offsets = [0, 32], sizes = [8, 32], strides = [1, 1]} : vector<8x128xf32> to vector<8x32xf32>
    %127 = vector.extract_strided_slice %120 {offsets = [0, 64], sizes = [8, 32], strides = [1, 1]} : vector<8x128xf32> to vector<8x32xf32>
    %128 = vector.extract_strided_slice %124 {offsets = [0, 96], sizes = [8, 32], strides = [1, 1]} : vector<8x128xf32> to vector<8x32xf32>
    %129 = arith.mulf %126, %114 : vector<8x32xf32>
    %130 = arith.mulf %125, %127 : vector<8x32xf32>
    %131 = arith.addf %129, %130 : vector<8x32xf32>
    %132 = math.tanh %131 : vector<8x32xf32>
    %133 = arith.mulf %128, %132 : vector<8x32xf32>
    %c56 = arith.constant 56 : index
    %c0_40 = arith.constant 0 : index
    %134 = vector.load %arg8[%c56, %c0_40] : memref<64x256xf32, #tpu.memory_space<vmem>>, vector<8x128xf32>
    %cst_41 = arith.constant dense<0.000000e+00> : vector<8x128xf32>
    %135 = tpu.matmul %133, %12, %cst_41 {dimension_numbers = #tpu.dot_dimension_numbers<[1], [0], [0], [1], [0, 0, 1, 1], [], []>} : vector<8x32xf32>, vector<32x128xf32>, vector<8x128xf32> -> vector<8x128xf32>
    %136 = arith.addf %134, %135 : vector<8x128xf32>
    %137 = math.tanh %136 : vector<8x128xf32>
    %cst_42 = arith.constant 5.000000e-01 : f32
    %138 = vector.broadcast %cst_42 : f32 to vector<8x128xf32>
    %139 = arith.mulf %138, %137 : vector<8x128xf32>
    %cst_43 = arith.constant 5.000000e-01 : f32
    %140 = vector.broadcast %cst_43 : f32 to vector<8x128xf32>
    %141 = arith.addf %139, %140 : vector<8x128xf32>
    %142 = vector.extract_strided_slice %141 {offsets = [0, 0], sizes = [8, 32], strides = [1, 1]} : vector<8x128xf32> to vector<8x32xf32>
    %143 = vector.extract_strided_slice %141 {offsets = [0, 32], sizes = [8, 32], strides = [1, 1]} : vector<8x128xf32> to vector<8x32xf32>
    %144 = vector.extract_strided_slice %137 {offsets = [0, 64], sizes = [8, 32], strides = [1, 1]} : vector<8x128xf32> to vector<8x32xf32>
    %145 = vector.extract_strided_slice %141 {offsets = [0, 96], sizes = [8, 32], strides = [1, 1]} : vector<8x128xf32> to vector<8x32xf32>
    %146 = arith.mulf %143, %131 : vector<8x32xf32>
    %147 = arith.mulf %142, %144 : vector<8x32xf32>
    %148 = arith.addf %146, %147 : vector<8x32xf32>
    %149 = math.tanh %148 : vector<8x32xf32>
    %150 = arith.mulf %145, %149 : vector<8x32xf32>
    %c56_44 = arith.constant 56 : index
    %c128 = arith.constant 128 : index
    %151 = vector.load %arg8[%c56_44, %c128] : memref<64x256xf32, #tpu.memory_space<vmem>>, vector<8x128xf32>
    %152 = math.tanh %151 : vector<8x128xf32>
    %cst_45 = arith.constant 5.000000e-01 : f32
    %153 = vector.broadcast %cst_45 : f32 to vector<8x128xf32>
    %154 = arith.mulf %153, %152 : vector<8x128xf32>
    %cst_46 = arith.constant 5.000000e-01 : f32
    %155 = vector.broadcast %cst_46 : f32 to vector<8x128xf32>
    %156 = arith.addf %154, %155 : vector<8x128xf32>
    %157 = vector.extract_strided_slice %156 {offsets = [0, 0], sizes = [8, 32], strides = [1, 1]} : vector<8x128xf32> to vector<8x32xf32>
    %158 = vector.extract_strided_slice %152 {offsets = [0, 64], sizes = [8, 32], strides = [1, 1]} : vector<8x128xf32> to vector<8x32xf32>
    %159 = vector.extract_strided_slice %156 {offsets = [0, 96], sizes = [8, 32], strides = [1, 1]} : vector<8x128xf32> to vector<8x32xf32>
    %160 = arith.mulf %157, %158 : vector<8x32xf32>
    %161 = math.tanh %160 : vector<8x32xf32>
    %162 = arith.mulf %159, %161 : vector<8x32xf32>
    %c0_47 = arith.constant 0 : index
    %c0_48 = arith.constant 0 : index
    %163 = vector.load %arg4[%c0_47, %c0_48] : memref<1x32xf32, #tpu.memory_space<vmem>>, vector<1x32xf32>
    %164 = vector.broadcast %163 : vector<1x32xf32> to vector<8x32xf32>
    %165 = arith.mulf %150, %164 : vector<8x32xf32>
    %cst_49 = arith.constant dense<0.000000e+00> : vector<8xf32>
    %166 = vector.multi_reduction <add>, %165, %cst_49 [1] : vector<8x32xf32> to vector<8xf32>
    %167 = vector.shape_cast %166 : vector<8xf32> to vector<8x1xf32>
    %c0_50 = arith.constant 0 : index
    %c0_51 = arith.constant 0 : index
    %168 = vector.load %arg5[%c0_50, %c0_51] : memref<1x32xf32, #tpu.memory_space<vmem>>, vector<1x32xf32>
    %169 = vector.broadcast %168 : vector<1x32xf32> to vector<8x32xf32>
    %170 = arith.mulf %162, %169 : vector<8x32xf32>
    %cst_52 = arith.constant dense<0.000000e+00> : vector<8xf32>
    %171 = vector.multi_reduction <add>, %170, %cst_52 [1] : vector<8x32xf32> to vector<8xf32>
    %172 = vector.shape_cast %171 : vector<8xf32> to vector<8x1xf32>
    %173 = arith.addf %167, %172 : vector<8x1xf32>
    %c0_53 = arith.constant 0 : index
    %c0_54 = arith.constant 0 : index
    %174 = vector.load %arg6[%c0_53, %c0_54] : memref<1x1xf32, #tpu.memory_space<vmem>>, vector<1x1xf32>
    %175 = vector.broadcast %174 : vector<1x1xf32> to vector<8x1xf32>
    %176 = arith.addf %173, %175 : vector<8x1xf32>
    %c0_55 = arith.constant 0 : index
    %c0_56 = arith.constant 0 : index
    %177 = vector.load %arg7[%c0_55, %c0_56] : memref<8x1xf32, #tpu.memory_space<vmem>>, vector<8x1xf32>
    tpu.vector_store %arg7[%c0_55, %c0_56], %176 {strides = array<i32>} : memref<8x1xf32, #tpu.memory_space<vmem>>, vector<8x1xf32>,
    return
  }
}

</mosaic_0001>

<bundles_post_ra>
// kernel: tpu_custom_call.1
= control target key start
LH: loop header
LB: loop body
LE: loop exit
PB: predicated region body
PF: predicated region fallthrough
CT: control target
= control target key end

     0   :  { %s1696_s0 = inlined_call_operand.vmem [shape: s32[64,1], index: 0, kind: input, shape index: {}]   ;;  %s1697_s1 = inlined_call_operand.hbm [shape: f32[50,256], index: 1, kind: input, shape index: {}]   ;;  %s1698_s2 = inlined_call_operand.vmem [shape: f32[1,256], index: 2, kind: input, shape index: {}]   ;;  %s1699_s3 = inlined_call_operand.vmem [shape: f32[32,128], index: 3, kind: input, shape index: {}]   ;;  %s1700_s4 = inlined_call_operand.vmem [shape: f32[1,32], index: 4, kind: input, shape index: {}]   ;;  %s1701_s5 = inlined_call_operand.vmem [shape: f32[1,32], index: 5, kind: input, shape index: {}]   ;;  %s1702_s6 = inlined_call_operand.<no memory space> [shape: f32[1,1], index: 6, kind: input, shape index: {}]   ;;  %s1703_s7 = inlined_call_operand.vmem [shape: f32[8,1], index: 7, kind: output, shape index: {}]  }
   0x1   :  { %v12_v0 = vstv %s1702_s6 }
   0x2   :  { %13 = vst [vmem:[#allocation3] sm:$0x1] %v12_v0 }
   0x3   :  { %14 = vsyncpa [#allocation5], 0  ;;  %s1434_s26 = smov [#allocation4]   ;;  %s1410_s30 = scalar_lea.hbm %s1697_s1, 1792 }
   0x4   :  { %s22_s27 = sshll.u32 %s1434_s26, 4  ;;  %p1411_p0 = scmp.ne.s32.totalorder %s1697_s1, %s1410_s30  ;;  %s23_s27 = int_to_ptr.vmem [resolvable:$true] %s22_s27 }
   0x5   :  { %p1414_p1 = scmp.lt.u32.totalorder %s1410_s30, %s1697_s1 }
   0x7   :  { %p1416_p2 = pnand %p1414_p1, %p1411_p0 }
   0x9   :  { %1419 = shalt.err (!%p1416_p2)
}
   0xa   :  { %s1420_s6 = scalar_lea.vmem %s23_s27, 1792  ;;  %p1425_p4 = scmp.lt.s32.totalorder %s23_s27, %s23_s27 }
   0xb   :  { %p1421_p3 = scmp.ne.s32.totalorder %s23_s27, %s1420_s6  ;;  %p1426_p5 = scmp.lt.s32.totalorder %s1420_s6, %s1420_s6 }
   0xd   :  { %p1427_p6 = por %p1426_p5, %p1425_p4 }
   0xf   :  { %p1428_p7 = pnand %p1427_p6, %p1421_p3 }
  0x11   :  { %1431 = shalt.err (!%p1428_p7)
}
  0x12   :  { %s1435_s12 = smov 256   ;;  %s1436_s13 = smov 16  }
  0x13   :  { %28 = dma.hbm_to_vmem [thread:$0]  %s1697_s1, 1792, %s23_s27, [#allocation5], %s1435_s12, %s1435_s12, %s1436_s13  }
  0x14   :  { %1432 = dma.done.wait [#allocation5], 1792  }
  0x15   :  { %1433 = vsyncadd [#allocation5], 4294965504  ;;  %v1437_v1 = vmov 0   ;;  %v1438_v2 = vmov 0.0   ;;  %v44_v3 = vld [vmem:[%s1696_s0 + $0x10] sm:$0xff]  ;;  %v42_v4 = vld [vmem:[%s1696_s0] sm:$0xff]  ;;  %v50_v38 = vlaneseq }
  0x16   :  { %1373 = vset.pattern.permute.xlu1 %v1437_v1  ;;  %1372 = vset.pattern.permute.xlu0 %v1437_v1  ;;  %v45_v5 = vld [vmem:[%s1696_s0 + $0x18] sm:$0xff]  ;;  %v43_v6 = vld [vmem:[%s1696_s0 + $0x8] sm:$0xff]  ;;  %v1439_v11 = vmov 0.0|0.0   ;;  %v46_v22 = vld [vmem:[%s1696_s0 + $0x20] sm:$0xff]  ;;  %vm151_vm0 = vcmask 1041408   ;;  %vm1440_vm1 = vmmov 0  }
  0x17   :  { %222 = vmatprep.mubr.f32.mxu1 %v1438_v2  ;;  %59 = vperm.xlu1 %1373, %v44_v3   ;;  %v101_v7 = vld [vmem:[#allocation4 + $0x8] sm:$0xff]  ;;  %v103_v8 = vld [vmem:[#allocation4 + $0x18] sm:$0xff]  ;;  %v100_v9 = vld [vmem:[#allocation4] sm:$0xff]  ;;  %v51_v39 = vand.u32 127, %v50_v38  ;;  %vm126_vm2 = vcmask 408576   ;;  %v1583_v56 = vshrl.u32 %v50_v38, 7 }
  0x18   :  { %53 = vperm.xlu0 %1372, %v42_v4   ;;  %v102_v10 = vld [vmem:[#allocation4 + $0x10] sm:$0xff]  ;;  %1305 = vmatprep.subr.bf16.mxu0 %v1439_v11  ;;  %v1287_v12 = vpack.c.bf16 %v103_v8, %v101_v7  ;;  %v105_v14 = vld [vmem:[#allocation4 + $0x28] sm:$0xff]  ;;  %v107_v15 = vld [vmem:[#allocation4 + $0x38] sm:$0xff]  ;;  %s1442_s15 = smov 32   ;;  %vm292_vm11 = vcmask 261120   ;;  %s1443_s16 = smov 96  }
  0x19   :  { %v1289_v13 = vpack.c.bf16 %v102_v10, %v100_v9  ;;  %v104_v16 = vld [vmem:[#allocation4 + $0x20] sm:$0xff]  ;;  %v1291_v17 = vpack.c.bf16 %v107_v15, %v105_v14  ;;  %v106_v18 = vld [vmem:[#allocation4 + $0x30] sm:$0xff]  ;;  %v109_v19 = vld [vmem:[#allocation4 + $0x48] sm:$0xff]  ;;  %1218 = vmatprep.mubr.msk.f32.mxu0 %vm1440_vm1, %v1438_v2  ;;  %v118_v57 = vsub.s32 0, %v1583_v56  ;;  %vm1124_vm12 = vcmask 7168  }
  0x1a   :  { %v111_v20 = vld [vmem:[#allocation4 + $0x58] sm:$0xff]  ;;  %v47_v21 = vld [vmem:[%s1696_s0 + $0x28] sm:$0xff]  ;;  %1288 = vmatprep.subr.bf16.mxu1 %v1287_v12  ;;  %v1293_v23 = vpack.c.bf16 %v106_v18, %v104_v16  ;;  %v110_v28 = vld [vmem:[#allocation4 + $0x50] sm:$0xff] }
  0x1b   :  { %62 = vperm.xlu1 %1373, %v45_v5   ;;  %1290 = vmatpush1.bf16.msra.mxu1 %v1289_v13  ;;  %v287_v24 = vld [vmem:[%s1699_s3] sm:$0xff]  ;;  %v288_v25 = vld [vmem:[%s1699_s3 + $0x8] sm:$0xff]  ;;  %v1295_v26 = vpack.c.bf16 %v111_v20, %v109_v19  ;;  %v49_v30 = vld [vmem:[%s1696_s0 + $0x38] sm:$0xff] }
  0x1c   :  { %56 = vperm.xlu0 %1372, %v43_v6   ;;  %1292 = vmatprep.subr.bf16.mxu1 %v1291_v17  ;;  %v108_v27 = vld [vmem:[#allocation4 + $0x40] sm:$0xff]  ;;  %v1525_v29 = vpack.c.bf16 %v288_v25, %v287_v24  ;;  %v48_v31 = vld [vmem:[%s1696_s0 + $0x30] sm:$0xff]  ;;  %v113_v33 = vld [vmem:[#allocation4 + $0x68] sm:$0x3] }
  0x1d   :  { %v1297_v32 = vpack.c.bf16 %v110_v28, %v108_v27  ;;  %v112_v34 = vld [vmem:[#allocation4 + $0x60] sm:$0x3]  ;;  %v289_v35 = vld [vmem:[%s1699_s3 + $0x10] sm:$0xff]  ;;  %v290_v36 = vld [vmem:[%s1699_s3 + $0x18] sm:$0xff] }
  0x1e   :  { %1307 = vmatpush3.bf16.msra.mxu0 %v1525_v29  ;;  %v1542_v37 = vpack.c.bf16 %v290_v36, %v289_v35  ;;  %v1589_v58 = vld [vmem:[%s1698_s2] sm:$0x3]  ;;  %s1441_s2 = smov 64  }
  0x1f   :  { %68 = vperm.xlu1 %1373, %v47_v21   ;;  %1294 = vmatpush1.bf16.msra.mxu1 %v1293_v23  ;;  %v119_v59 = vrot.slane %v1589_v58, %v118_v57 }
  0x20   :  { %65 = vperm.xlu0 %1372, %v46_v22   ;;  %1308 = vmatprep.subr.bf16.mxu0 %v1439_v11 }
  0x21   :  { %1296 = vmatprep.subr.bf16.mxu1 %v1295_v26 }
  0x22   :  { %1310 = vmatpush3.bf16.msra.mxu0 %v1542_v37 }
  0x23   :  { %74 = vperm.xlu1 %1373, %v49_v30   ;;  %1298 = vmatpush1.bf16.msra.mxu1 %v1297_v32 }
  0x24   :  { %71 = vperm.xlu0 %1372, %v48_v31   ;;  %1139 = vmatprep.subr.msk.mxu1 %vm151_vm0, %v113_v33 }
  0x25   :  { %1311 = vmatprep.subr.bf16.mxu0 %v1439_v11 }
  0x27   :  { %1140 = vmatpush1.msk.msra.mxu1 %vm151_vm0, %v112_v34 }
  0x28   :  { %1299 = vmatprep.subr.bf16.mxu1 %v1439_v11 }
  0x96   :  { %v60_v42 = vpop.permute.xlu1 %59 }
  0x97   :  { %v54_v40 = vpop.permute.xlu0 %53  ;;  %vm78_vm4 = vcmp.eq.s32.totalorder %v51_v39, %v60_v42 }
  0x98   :  { %vm76_vm3 = vcmp.eq.s32.totalorder %v51_v39, %v54_v40  ;;  %v1133_v45 = vsel %vm78_vm4, 1.0, %v1438_v2 }
  0x99   :  { %v1131_v41 = vsel %vm76_vm3, 1.0, %v1438_v2 }
  0x9a   :  { %1141 = vmatmul.mubr.msk.f32.vlgmr.msra.gmra.mrb[0].mxu1 %vm126_vm2, %v1131_v41  ;;  %v63_v46 = vpop.permute.xlu1 %62 }
  0x9b   :  { %1301 = vmatpush3.bf16.msra.mxu1 %v1525_v29  ;;  %v57_v43 = vpop.permute.xlu0 %56  ;;  %228 = vmatprep.mubr.f32.mxu1 %v1438_v2  ;;  %vm79_vm6 = vcmp.eq.s32.totalorder %v51_v39, %v63_v46 }
  0x9c   :  { %vm77_vm5 = vcmp.eq.s32.totalorder %v51_v39, %v57_v43  ;;  %1302 = vmatprep.subr.bf16.mxu1 %v1439_v11  ;;  %v1134_v48 = vsel %vm79_vm6, 1.0, %v1438_v2 }
  0x9d   :  { %v1132_v44 = vsel %vm77_vm5, 1.0, %v1438_v2 }
  0x9e   :  { %1142 = vmatmul.mubr.msk.f32.gmra.mrb[2].mxu1 %vm126_vm2, %v1132_v44  ;;  %v69_v49 = vpop.permute.xlu1 %68 }
  0x9f   :  { %234 = vmatprep.mubr.f32.mxu1 %v1438_v2  ;;  %1304 = vmatpush3.bf16.msra.mxu1 %v1542_v37  ;;  %v66_v47 = vpop.permute.xlu0 %65  ;;  %vm81_vm8 = vcmp.eq.s32.totalorder %v51_v39, %v69_v49 }
  0xa0   :  { %1341 = vmatprep.subr.bf16.mxu1 %v1439_v11  ;;  %vm80_vm7 = vcmp.eq.s32.totalorder %v51_v39, %v66_v47  ;;  %v1136_v52 = vsel %vm81_vm8, 1.0, %v1438_v2 }
  0xa1   :  { %v1135_v50 = vsel %vm80_vm7, 1.0, %v1438_v2 }
  0xa2   :  { %1143 = vmatmul.mubr.msk.f32.gmra.mrb[4].mxu1 %vm126_vm2, %v1133_v45  ;;  %v75_v53 = vpop.permute.xlu1 %74 }
  0xa3   :  { %240 = vmatprep.mubr.f32.mxu1 %v1438_v2  ;;  %v72_v51 = vpop.permute.xlu0 %71  ;;  %vm83_vm10 = vcmp.eq.s32.totalorder %v51_v39, %v75_v53 }
  0xa4   :  { %vm82_vm9 = vcmp.eq.s32.totalorder %v51_v39, %v72_v51  ;;  %v1138_v55 = vsel %vm83_vm10, 1.0, %v1438_v2 }
  0xa5   :  { %v1137_v54 = vsel %vm82_vm9, 1.0, %v1438_v2 }
  0xa6   :  { %1144 = vmatmul.mubr.msk.f32.gmra.mrb[6].mxu1 %vm126_vm2, %v1134_v48 }
  0xa7   :  { %246 = vmatprep.mubr.f32.mxu1 %v1438_v2 }
  0xaa   :  { %1145 = vmatmul.mubr.msk.f32.gmra.mrb[8].mxu1 %vm126_vm2, %v1135_v50 }
  0xab   :  { %252 = vmatprep.mubr.f32.mxu1 %v1438_v2 }
  0xae   :  { %1146 = vmatmul.mubr.msk.f32.gmra.mrb[10].mxu1 %vm126_vm2, %v1136_v52 }
  0xaf   :  { %258 = vmatprep.mubr.f32.mxu1 %v1438_v2 }
  0xb2   :  { %1147 = vmatmul.mubr.msk.f32.gmra.mrb[12].mxu1 %vm126_vm2, %v1137_v54 }
  0xb3   :  { %264 = vmatprep.mubr.f32.mxu1 %v1438_v2 }
  0xb6   :  { %1148 = vmatmul.mubr.msk.f32.gmra.mrb[14].mxu1 %vm126_vm2, %v1138_v55 }
  0xb7   :  { %1207 = vmatprep.mubr.msk.f32.mxu1 %vm1440_vm1, %v1438_v2 }
  0xba   :  { %1208 = vmatmul.mubr.f32.vlgmr.msra.gmra.mrb[0].mxu1 %v1438_v2 }
  0xbb   :  { %1343 = vmatpush3.bf16.msra.mxu1 %v1525_v29  ;;  %1284 = vmatprep.mubr.msk.f32.mxu1 %vm1440_vm1, %v1438_v2 }
  0xbc   :  { %1344 = vmatprep.subr.bf16.mxu1 %v1439_v11 }
  0xbf   :  { %1346 = vmatpush3.bf16.msra.mxu1 %v1542_v37 }
 0x171   :  { %v230_v60 = vpop.f32.mrb[2].mxu1 }
 0x172   :  { %v231_v61 = vadd.f32 %v230_v60, %v119_v59  ;;  %v232_v62 = vpop.f32.mrb[3].mxu1 }
 0x175   :  { %v236_v63 = vpop.f32.mrb[4].mxu1 }
 0x176   :  { %v1592_v0 = vadd.f32 %v236_v63, %v119_v59  ;;  %v238_v1 = vpop.f32.mrb[5].mxu1 }
 0x179   :  { %v242_v3 = vpop.f32.mrb[6].mxu1 }
 0x17a   :  { %v1594_v4 = vadd.f32 %v242_v3, %v119_v59  ;;  %v244_v5 = vpop.f32.mrb[7].mxu1 }
 0x17d   :  { %v248_v6 = vpop.f32.mrb[8].mxu1 }
 0x17e   :  { %v1596_v7 = vadd.f32 %v248_v6, %v119_v59  ;;  %v250_v8 = vpop.f32.mrb[9].mxu1 }
 0x181   :  { %v254_v9 = vpop.f32.mrb[10].mxu1 }
 0x182   :  { %v1598_v10 = vadd.f32 %v254_v9, %v119_v59  ;;  %v256_v12 = vpop.f32.mrb[11].mxu1 }
 0x185   :  { %v260_v13 = vpop.f32.mrb[12].mxu1 }
 0x186   :  { %v1600_v14 = vadd.f32 %v260_v13, %v119_v59  ;;  %v262_v15 = vpop.f32.mrb[13].mxu1 }
 0x189   :  { %v266_v16 = vpop.f32.mrb[14].mxu1 }
 0x18a   :  { %v1602_v17 = vadd.f32 %v266_v16, %v119_v59  ;;  %v1604_v18 = vpop.f32.mrb[15].mxu1 }
 0x18d   :  { %v362_v19 = vpop.f32.mrb[0].mxu1 }
 0x18e   :  { %v1347_v20 = vadd.f32 %v362_v19, %v119_v59  ;;  %v1209_v21 = vpop.f32.mrb[1].mxu1 }
 0x190   :  { %1374 = vtanh.f32 %v1347_v20 }
 0x19a   :  { %v1375_v22 = vpop.eup %1374 }
 0x19b   :  { %372 = vrot.lane.b32.xlu0 %v1375_v22, %s1441_s2  ;;  %v368_v23 = vmul.f32 0.5, %v1375_v22 }
 0x19d   :  { %v369_v24 = vadd.f32 0.5, %v368_v23 }
 0x19f   :  { %v370_v27 = vmul.f32 0.0, %v369_v24 }
 0x20d   :  { %v373_v25 = vpop.permute.xlu0 %372 }
 0x20e   :  { %v375_v26 = vmul.f32 %v373_v25, %v369_v24 }
 0x210   :  { %377 = vrot.lane.b32.xlu1 %v375_v26, %s1442_s15 }
 0x282   :  { %v378_v28 = vpop.permute.xlu1 %377 }
 0x283   :  { %v380_v30 = vadd.f32 %v378_v28, %v370_v27 }
 0x285   :  { %1376 = vtanh.f32 %v380_v30 }
 0x28f   :  { %v1377_v31 = vpop.eup %1376 }
 0x290   :  { %383 = vrot.lane.b32.xlu0 %v1377_v31, %s1441_s2 }
 0x302   :  { %v384_v32 = vpop.permute.xlu0 %383 }
 0x303   :  { %v386_v33 = vmul.f32 %v384_v32, %v369_v24 }
 0x305   :  { %389 = vrot.lane.b32.xlu1 %v386_v33, %s1442_s15 }
 0x377   :  { %v390_v34 = vpop.permute.xlu1 %389 }
 0x378   :  { %1219 = vmatmul.mubr.msk.f32.vlgmr.msra.gmra.mrb[0].mxu0 %vm292_vm11, %v390_v34 }
 0x379   :  { %1313 = vmatpush3.bf16.msra.mxu0 %v1525_v29  ;;  %1229 = vmatprep.mubr.msk.f32.mxu0 %vm1440_vm1, %v1438_v2 }
 0x37a   :  { %1314 = vmatprep.subr.bf16.mxu0 %v1439_v11 }
 0x37d   :  { %1316 = vmatpush3.bf16.msra.mxu0 %v1542_v37 }
 0x37e   :  { %1317 = vmatprep.subr.bf16.mxu0 %v1439_v11 }
 0x44b   :  { %v459_v35 = vpop.f32.mrb[0].mxu0 }
 0x44c   :  { %v463_v36 = vadd.f32 %v459_v35, %v231_v61  ;;  %v1220_v38 = vpop.f32.mrb[1].mxu0 }
 0x44e   :  { %1378 = vtanh.f32 %v463_v36 }
 0x458   :  { %v1379_v39 = vpop.eup %1378 }
 0x459   :  { %469 = vrot.lane.b32.xlu0 %v1379_v39, %s1441_s2  ;;  %v465_v40 = vmul.f32 0.5, %v1379_v39 }
 0x45b   :  { %v466_v41 = vadd.f32 0.5, %v465_v40 }
 0x45d   :  { %v467_v44 = vmul.f32 %v466_v41, %v380_v30 }
 0x4cb   :  { %v470_v42 = vpop.permute.xlu0 %469 }
 0x4cc   :  { %v472_v43 = vmul.f32 %v470_v42, %v466_v41 }
 0x4ce   :  { %474 = vrot.lane.b32.xlu1 %v472_v43, %s1442_s15 }
 0x540   :  { %v475_v45 = vpop.permute.xlu1 %474 }
 0x541   :  { %v477_v46 = vadd.f32 %v475_v45, %v467_v44 }
 0x543   :  { %1380 = vtanh.f32 %v477_v46 }
 0x54d   :  { %v1381_v47 = vpop.eup %1380 }
 0x54e   :  { %480 = vrot.lane.b32.xlu0 %v1381_v47, %s1441_s2 }
 0x5c0   :  { %v481_v48 = vpop.permute.xlu0 %480 }
 0x5c1   :  { %v483_v49 = vmul.f32 %v481_v48, %v466_v41 }
 0x5c3   :  { %486 = vrot.lane.b32.xlu1 %v483_v49, %s1442_s15 }
 0x635   :  { %v487_v50 = vpop.permute.xlu1 %486 }
 0x636   :  { %1230 = vmatmul.mubr.msk.f32.vlgmr.msra.gmra.mrb[2].mxu0 %vm292_vm11, %v487_v50 }
 0x637   :  { %1319 = vmatpush3.bf16.msra.mxu0 %v1525_v29  ;;  %1240 = vmatprep.mubr.msk.f32.mxu0 %vm1440_vm1, %v1438_v2 }
 0x638   :  { %1320 = vmatprep.subr.bf16.mxu0 %v1439_v11 }
 0x63b   :  { %1322 = vmatpush3.bf16.msra.mxu0 %v1542_v37 }
 0x63c   :  { %1323 = vmatprep.subr.bf16.mxu0 %v1439_v11 }
 0x709   :  { %v556_v51 = vpop.f32.mrb[2].mxu0 }
 0x70a   :  { %v560_v52 = vadd.f32 %v556_v51, %v1592_v0  ;;  %v1231_v53 = vpop.f32.mrb[3].mxu0 }
 0x70c   :  { %1382 = vtanh.f32 %v560_v52 }
 0x716   :  { %v1383_v54 = vpop.eup %1382 }
 0x717   :  { %566 = vrot.lane.b32.xlu0 %v1383_v54, %s1441_s2  ;;  %v562_v55 = vmul.f32 0.5, %v1383_v54 }
 0x719   :  { %v563_v57 = vadd.f32 0.5, %v562_v55 }
 0x71b   :  { %v564_v61 = vmul.f32 %v563_v57, %v477_v46 }
 0x789   :  { %v567_v59 = vpop.permute.xlu0 %566 }
 0x78a   :  { %v569_v60 = vmul.f32 %v567_v59, %v563_v57 }
 0x78c   :  { %571 = vrot.lane.b32.xlu1 %v569_v60, %s1442_s15 }
 0x7fe   :  { %v572_v62 = vpop.permute.xlu1 %571 }
 0x7ff   :  { %v574_v63 = vadd.f32 %v572_v62, %v564_v61 }
 0x801   :  { %1384 = vtanh.f32 %v574_v63 }
 0x80b   :  { %v1385_v1 = vpop.eup %1384 }
 0x80c   :  { %577 = vrot.lane.b32.xlu0 %v1385_v1, %s1441_s2 }
 0x87e   :  { %v578_v3 = vpop.permute.xlu0 %577 }
 0x87f   :  { %v580_v0 = vmul.f32 %v578_v3, %v563_v57 }
 0x881   :  { %583 = vrot.lane.b32.xlu1 %v580_v0, %s1442_s15 }
 0x8f3   :  { %v584_v5 = vpop.permute.xlu1 %583 }
 0x8f4   :  { %1241 = vmatmul.mubr.msk.f32.vlgmr.msra.gmra.mrb[4].mxu0 %vm292_vm11, %v584_v5 }
 0x8f5   :  { %1325 = vmatpush3.bf16.msra.mxu0 %v1525_v29  ;;  %1251 = vmatprep.mubr.msk.f32.mxu0 %vm1440_vm1, %v1438_v2 }
 0x8f6   :  { %1326 = vmatprep.subr.bf16.mxu0 %v1439_v11 }
 0x8f9   :  { %1328 = vmatpush3.bf16.msra.mxu0 %v1542_v37 }
 0x8fa   :  { %1329 = vmatprep.subr.bf16.mxu0 %v1439_v11 }
 0x9c7   :  { %v653_v6 = vpop.f32.mrb[4].mxu0 }
 0x9c8   :  { %v657_v8 = vadd.f32 %v653_v6, %v1594_v4  ;;  %v1242_v9 = vpop.f32.mrb[5].mxu0  ;;  %v122_v6 = vsub.s32 1, %v1583_v56 }
 0x9ca   :  { %1386 = vtanh.f32 %v657_v8  ;;  %v123_v8 = vrot.slane %v1589_v58, %v122_v6 }
 0x9d4   :  { %v1387_v12 = vpop.eup %1386 }
 0x9d5   :  { %663 = vrot.lane.b32.xlu0 %v1387_v12, %s1441_s2  ;;  %v659_v13 = vmul.f32 0.5, %v1387_v12 }
 0x9d7   :  { %v660_v15 = vadd.f32 0.5, %v659_v13 }
 0x9d9   :  { %v661_v20 = vmul.f32 %v660_v15, %v574_v63 }
 0xa47   :  { %v664_v16 = vpop.permute.xlu0 %663 }
 0xa48   :  { %v666_v19 = vmul.f32 %v664_v16, %v660_v15 }
 0xa4a   :  { %668 = vrot.lane.b32.xlu1 %v666_v19, %s1442_s15 }
 0xabc   :  { %v669_v21 = vpop.permute.xlu1 %668 }
 0xabd   :  { %v671_v22 = vadd.f32 %v669_v21, %v661_v20 }
 0xabf   :  { %1388 = vtanh.f32 %v671_v22 }
 0xac9   :  { %v1389_v23 = vpop.eup %1388 }
 0xaca   :  { %674 = vrot.lane.b32.xlu0 %v1389_v23, %s1441_s2 }
 0xb3c   :  { %v675_v24 = vpop.permute.xlu0 %674 }
 0xb3d   :  { %v677_v4 = vmul.f32 %v675_v24, %v660_v15  ;;  %v269_v15 = vadd.f32 %v1604_v18, %v123_v8 }
 0xb3f   :  { %680 = vrot.lane.b32.xlu1 %v677_v4, %s1442_s15  ;;  %v1157_v4 = vld [vmem:[%s1701_s5] ss:$0 sm:$0xff] }
 0xbb1   :  { %v681_v25 = vpop.permute.xlu1 %680 }
 0xbb2   :  { %1252 = vmatmul.mubr.msk.f32.vlgmr.msra.gmra.mrb[6].mxu0 %vm292_vm11, %v681_v25 }
 0xbb3   :  { %1331 = vmatpush3.bf16.msra.mxu0 %v1525_v29  ;;  %1262 = vmatprep.mubr.msk.f32.mxu0 %vm1440_vm1, %v1438_v2 }
 0xbb4   :  { %1332 = vmatprep.subr.bf16.mxu0 %v1439_v11 }
 0xbb7   :  { %1334 = vmatpush3.bf16.msra.mxu0 %v1542_v37 }
 0xbb8   :  { %1335 = vmatprep.subr.bf16.mxu0 %v1439_v11 }
 0xc85   :  { %v750_v26 = vpop.f32.mrb[6].mxu0 }
 0xc86   :  { %v754_v27 = vadd.f32 %v750_v26, %v1596_v7  ;;  %v1253_v28 = vpop.f32.mrb[7].mxu0 }
 0xc88   :  { %1390 = vtanh.f32 %v754_v27 }
 0xc92   :  { %v1391_v30 = vpop.eup %1390 }
 0xc93   :  { %760 = vrot.lane.b32.xlu0 %v1391_v30, %s1441_s2  ;;  %v756_v31 = vmul.f32 0.5, %v1391_v30 }
 0xc95   :  { %v757_v32 = vadd.f32 0.5, %v756_v31  ;;  %v1156_v31 = vld [vmem:[%s1700_s4] ss:$0 sm:$0xff] }
 0xc97   :  { %v758_v35 = vmul.f32 %v757_v32, %v671_v22 }
 0xd05   :  { %v761_v33 = vpop.permute.xlu0 %760 }
 0xd06   :  { %v763_v34 = vmul.f32 %v761_v33, %v757_v32 }
 0xd08   :  { %765 = vrot.lane.b32.xlu1 %v763_v34, %s1442_s15 }
 0xd7a   :  { %v766_v36 = vpop.permute.xlu1 %765 }
 0xd7b   :  { %v768_v38 = vadd.f32 %v766_v36, %v758_v35 }
 0xd7d   :  { %1392 = vtanh.f32 %v768_v38 }
 0xd87   :  { %v1393_v39 = vpop.eup %1392 }
 0xd88   :  { %771 = vrot.lane.b32.xlu0 %v1393_v39, %s1441_s2 }
 0xdfa   :  { %v772_v40 = vpop.permute.xlu0 %771 }
 0xdfb   :  { %v774_v7 = vmul.f32 %v772_v40, %v757_v32 }
 0xdfd   :  { %777 = vrot.lane.b32.xlu1 %v774_v7, %s1442_s15 }
 0xe6f   :  { %v778_v41 = vpop.permute.xlu1 %777 }
 0xe70   :  { %1263 = vmatmul.mubr.msk.f32.vlgmr.msra.gmra.mrb[8].mxu0 %vm292_vm11, %v778_v41 }
 0xe71   :  { %1337 = vmatpush3.bf16.msra.mxu0 %v1525_v29  ;;  %1273 = vmatprep.mubr.msk.f32.mxu0 %vm1440_vm1, %v1438_v2 }
 0xe72   :  { %1338 = vmatprep.subr.bf16.mxu0 %v1439_v11 }
 0xe75   :  { %1340 = vmatpush3.bf16.msra.mxu0 %v1542_v37 }
 0xf43   :  { %v847_v42 = vpop.f32.mrb[8].mxu0 }
 0xf44   :  { %v851_v43 = vadd.f32 %v847_v42, %v1598_v10  ;;  %v1264_v44 = vpop.f32.mrb[9].mxu0 }
 0xf45   :  { %v1158_v44 = vld [vmem:[#allocation3] ss:$0 sm:$0xff] }
 0xf46   :  { %1394 = vtanh.f32 %v851_v43 }
 0xf50   :  { %v1395_v45 = vpop.eup %1394 }
 0xf51   :  { %857 = vrot.lane.b32.xlu0 %v1395_v45, %s1441_s2  ;;  %v853_v46 = vmul.f32 0.5, %v1395_v45 }
 0xf53   :  { %v854_v47 = vadd.f32 0.5, %v853_v46 }
 0xf55   :  { %v855_v29 = vmul.f32 %v854_v47, %v768_v38 }
 0xfc3   :  { %v858_v48 = vpop.permute.xlu0 %857 }
 0xfc4   :  { %v860_v49 = vmul.f32 %v858_v48, %v854_v47 }
 0xfc6   :  { %862 = vrot.lane.b32.xlu1 %v860_v49, %s1442_s15 }
0x1038   :  { %v863_v2 = vpop.permute.xlu1 %862 }
0x1039   :  { %v865_v50 = vadd.f32 %v863_v2, %v855_v29 }
0x103b   :  { %1396 = vtanh.f32 %v865_v50 }
0x1045   :  { %v1397_v11 = vpop.eup %1396 }
0x1046   :  { %868 = vrot.lane.b32.xlu0 %v1397_v11, %s1441_s2 }
0x10b8   :  { %v869_v37 = vpop.permute.xlu0 %868 }
0x10b9   :  { %v871_v10 = vmul.f32 %v869_v37, %v854_v47 }
0x10bb   :  { %874 = vrot.lane.b32.xlu1 %v871_v10, %s1442_s15 }
0x112d   :  { %v875_v51 = vpop.permute.xlu1 %874 }
0x112e   :  { %1274 = vmatmul.mubr.msk.f32.vlgmr.msra.gmra.mrb[10].mxu0 %vm292_vm11, %v875_v51 }
0x1201   :  { %v944_v52 = vpop.f32.mrb[10].mxu0 }
0x1202   :  { %v948_v53 = vadd.f32 %v944_v52, %v1600_v14  ;;  %v1275_v54 = vpop.f32.mrb[11].mxu0 }
0x1204   :  { %1398 = vtanh.f32 %v948_v53 }
0x120e   :  { %v1399_v55 = vpop.eup %1398 }
0x120f   :  { %954 = vrot.lane.b32.xlu0 %v1399_v55, %s1441_s2  ;;  %v950_v57 = vmul.f32 0.5, %v1399_v55 }
0x1211   :  { %v951_v59 = vadd.f32 0.5, %v950_v57 }
0x1213   :  { %v952_v62 = vmul.f32 %v951_v59, %v865_v50 }
0x1281   :  { %v955_v60 = vpop.permute.xlu0 %954 }
0x1282   :  { %v957_v61 = vmul.f32 %v955_v60, %v951_v59 }
0x1284   :  { %959 = vrot.lane.b32.xlu1 %v957_v61, %s1442_s15 }
0x12f6   :  { %v960_v63 = vpop.permute.xlu1 %959 }
0x12f7   :  { %v962_v1 = vadd.f32 %v960_v63, %v952_v62 }
0x12f9   :  { %1400 = vtanh.f32 %v962_v1 }
0x1303   :  { %v1401_v3 = vpop.eup %1400 }
0x1304   :  { %965 = vrot.lane.b32.xlu0 %v1401_v3, %s1441_s2 }
0x1376   :  { %v966_v0 = vpop.permute.xlu0 %965 }
0x1377   :  { %v968_v14 = vmul.f32 %v966_v0, %v951_v59 }
0x1379   :  { %971 = vrot.lane.b32.xlu1 %v968_v14, %s1442_s15 }
0x13eb   :  { %v972_v5 = vpop.permute.xlu1 %971 }
0x13ec   :  { %1285 = vmatmul.mubr.msk.f32.vlgmr.msra.gmra.mrb[16].mxu1 %vm292_vm11, %v972_v5 }
0x14bf   :  { %v1041_v9 = vpop.f32.mrb[16].mxu1 }
0x14c0   :  { %v1045_v12 = vadd.f32 %v1041_v9, %v1602_v17  ;;  %v1286_v13 = vpop.f32.mrb[17].mxu1 }
0x14c2   :  { %1402 = vtanh.f32 %v1045_v12 }
0x14c3   :  { %1404 = vtanh.f32 %v269_v15 }
0x14cc   :  { %v1403_v16 = vpop.eup %1402 }
0x14cd   :  { %1051 = vrot.lane.b32.xlu0 %v1403_v16, %s1441_s2  ;;  %v1405_v19 = vpop.eup %1404  ;;  %v1047_v20 = vmul.f32 0.5, %v1403_v16 }
0x14ce   :  { %v1068_v22 = vmul.f32 0.5, %v1405_v19 }
0x14cf   :  { %v1048_v21 = vadd.f32 0.5, %v1047_v20 }
0x14d0   :  { %v1069_v58 = vadd.f32 0.5, %v1068_v22 }
0x14d1   :  { %1071 = vrot.lane.b32.xlu0 %v1405_v19, %s1441_s2  ;;  %v1049_v25 = vmul.f32 %v1048_v21, %v962_v1 }
0x153f   :  { %v1052_v56 = vpop.permute.xlu0 %1051 }
0x1540   :  { %v1054_v23 = vmul.f32 %v1052_v56, %v1048_v21 }
0x1542   :  { %1056 = vrot.lane.b32.xlu1 %v1054_v23, %s1442_s15 }
0x1543   :  { %v1072_v17 = vpop.permute.xlu0 %1071 }
0x1544   :  { %v1074_v24 = vmul.f32 %v1072_v17, %v1069_v58 }
0x1546   :  { %1406 = vtanh.f32 %v1074_v24 }
0x1550   :  { %v1407_v18 = vpop.eup %1406 }
0x1551   :  { %1077 = vrot.lane.b32.xlu0 %v1407_v18, %s1443_s16 }
0x1555   :  { %1104 = vrot.lane.b32.xlu0 %v1157_v4, %s1443_s16 }
0x15b4   :  { %v1057_v26 = vpop.permute.xlu1 %1056 }
0x15b5   :  { %v1059_v27 = vadd.f32 %v1057_v26, %v1049_v25 }
0x15b7   :  { %1408 = vtanh.f32 %v1059_v27 }
0x15c1   :  { %v1409_v28 = vpop.eup %1408 }
0x15c2   :  { %1062 = vrot.lane.b32.xlu1 %v1409_v28, %s1441_s2 }
0x15c3   :  { %v1078_v30 = vpop.permute.xlu0 %1077 }
0x15c4   :  { %v1080_v32 = vmul.f32 %v1078_v30, %v1069_v58 }
0x15c6   :  { %1087 = vrot.lane.b32.xlu1 %v1156_v31, %s1443_s16 }
0x15c7   :  { %v1105_v33 = vpop.permute.xlu0 %1104 }
0x15c8   :  { %v1107_v34 = vmul.f32 %v1105_v33, %v1080_v32 }
0x15ca   :  { %1109 = vrot.lane.b32.xlu0 %v1107_v34, %s1442_s15 }
0x1634   :  { %v1063_v35 = vpop.permute.xlu1 %1062 }
0x1635   :  { %v1065_v36 = vmul.f32 %v1063_v35, %v1048_v21 }
0x1638   :  { %v1088_v38 = vpop.permute.xlu1 %1087 }
0x1639   :  { %v1090_v39 = vmul.f32 %v1088_v38, %v1065_v36 }
0x163b   :  { %1092 = vrot.lane.b32.xlu1 %v1090_v39, %s1442_s15 }
0x163c   :  { %v1110_v40 = vpop.permute.xlu0 %1109 }
0x163d   :  { %v1112_v7 = vsel %vm292_vm11, %v1110_v40, 0.0 }
0x163e   :  { %1113 = vadd.xlane.f32.xlu0 %v1112_v7 }
0x16ad   :  { %v1093_v41 = vpop.permute.xlu1 %1092 }
0x16ae   :  { %v1095_v42 = vsel %vm292_vm11, %v1093_v41, 0.0 }
0x16af   :  { %1096 = vadd.xlane.f32.xlu1 %v1095_v42 }
0x16cb   :  { %v1114_v43 = vpop.xlane.xlu0 %1113 }
0x173c   :  { %v1097_v45 = vpop.xlane.xlu1 %1096 }
0x173d   :  { %v1115_v46 = vadd.f32 %v1114_v43, %v1097_v45 }
0x173f   :  { %v1123_v47 = vadd.f32 %v1158_v44, %v1115_v46 }
0x1741   :  { %1125 = vst.msk [vmem:[%s1703_s7] sm:$0xff] %vm1124_vm12, %v1123_v47 }
0x1742   :  { %1130 = vsyncpa [#allocation5], 1 }

</bundles_post_ra>
